<compile_context>
chip_gen: v7x
topology: tpu7x:2x2x1
jax: 0.10.0
libtpu: 0.0.40
codegen_flags: <defaults>
</compile_context>

<pallas_src>
import jax
import jax.numpy as jnp
from jax import lax
from jax.experimental import pallas as pl
from jax.experimental.pallas import tpu as pltpu


# ----------------------------------------------------------------------------
# Kernel 1: batched IBP prior.  One launch for the whole (L, N, K) stack of
# skill_logits matrices (grid over L, "parallel" so v7x megacore can split it).
# ----------------------------------------------------------------------------
def _ibp_prior_kernel(logits_ref, out_ref):
    _, N, K = logits_ref.shape
    logits = logits_ref[0]                                          # (N, K) f32

    # sigmoid + hard threshold (forward value of the straight-through estimator)
    s = 1.0 / (1.0 + jnp.exp(-logits))
    z = (s > 0.5).astype(jnp.float32)                               # (N, K)

    # Single Gram matrix, contracting over the task axis (no Z.T, no (1-Z) dot):
    #   M1[j,k] = <z[:,j], z[:,k]>
    m1 = lax.dot_general(z, z, (((0,), (0,)), ((), ())),
                         preferred_element_type=jnp.float32)        # (K, K)

    # Column sums m sit on M1's diagonal (z binary) -> extract as row & column
    # vectors with two tiny reduces instead of a transpose.
    rows = lax.broadcasted_iota(jnp.int32, (K, K), 0)
    cols = lax.broadcasted_iota(jnp.int32, (K, K), 1)
    eye = (rows == cols).astype(jnp.float32)
    m_row = jnp.sum(m1 * eye, axis=0, keepdims=True)                # (1, K)
    m_col = jnp.sum(m1 * eye, axis=1, keepdims=True)                # (K, 1)

    # Hamming distance between binary columns j,k = m_j + m_k - 2*M1[j,k];
    # columns identical <=> distance 0  -> unique-column multiplicities.
    hamming = m_col + m_row - 2.0 * m1
    col_eq = (hamming <= 0.5).astype(jnp.float32)                   # (K, K)
    count = jnp.sum(col_eq, axis=0, keepdims=True)                  # (1, K)

    # Integer log-factorial via a shared masked log table (log_i hoisted: one
    # EUP pass reused by all three lf() calls):
    #   lf(v) = lgamma(v+1) = sum_{i=1..N} log(i) * [i <= v]
    i_vals = lax.broadcasted_iota(jnp.float32, (N, K), 0) + 1.0     # (N, K)
    log_i = jnp.log(i_vals)

    def lf(v):  # v: (1, K), integer-valued floats in [0, N]
        mask = (i_vals <= v + 0.5).astype(jnp.float32)
        return jnp.sum(log_i * mask, axis=0, keepdims=True)         # (1, K)

    # sum over *unique* columns of lgamma(count+1): each distinct column of
    # multiplicity c contributes lgamma(c+1) once == c members * lgamma(c+1)/c.
    term1 = -jnp.sum(lf(count) / count)

    # m = Z.sum(dim=0); keep nonzero entries.
    nz = m_row > 0.5
    contrib = lf(float(N) - m_row) + lf(jnp.maximum(m_row - 1.0, 0.0))
    term2 = jnp.sum(jnp.where(nz, contrib, 0.0))

    neg_logp = -(term1 + term2)
    # Lane-dense output block; wrapper reads element [l, 0, 0].
    out_ref[...] = jnp.full(out_ref.shape, neg_logp, dtype=jnp.float32)


def ibp_priors(skill_logits_stack: jax.Array) -> jax.Array:
    """neg_log_IBP for a stacked (L, n_tasks, n_skills) batch. Returns (L,)."""
    L, N, K = skill_logits_stack.shape
    out = pl.pallas_call(
        _ibp_prior_kernel,
        out_shape=jax.ShapeDtypeStruct((L, 8, 128), jnp.float32),
        grid=(L,),
        in_specs=[pl.BlockSpec((1, N, K), lambda l: (l, 0, 0))],
        out_specs=pl.BlockSpec((1, 8, 128), lambda l: (l, 0, 0)),
        compiler_params=pltpu.CompilerParams(
            dimension_semantics=("parallel",)),
    )(skill_logits_stack.astype(jnp.float32))
    return out[:, 0, 0]


# ----------------------------------------------------------------------------
# Kernel 2: synthetic underlying-model loss  mean(x @ w)  — tiled matmul with
# bf16 MXU inputs, f32 VMEM accumulator, and a running per-token row-sum output
# (the full (M, V) logits matrix is never materialised).
# ----------------------------------------------------------------------------
def _loss_kernel(x_ref, w_ref, rowsum_ref, acc_ref):
    j = pl.program_id(1)                  # vocab-tile axis
    k = pl.program_id(2)                  # hidden (reduction) axis, innermost

    @pl.when(k == 0)
    def _zero_acc():
        acc_ref[...] = jnp.zeros_like(acc_ref)

    @pl.when(jnp.logical_and(j == 0, k == 0))
    def _zero_rowsum():
        rowsum_ref[...] = jnp.zeros_like(rowsum_ref)

    acc_ref[...] += jnp.dot(x_ref[...], w_ref[...],
                            preferred_element_type=jnp.float32)

    @pl.when(k == pl.num_programs(2) - 1)
    def _accumulate_rows():
        rowsum_ref[...] += jnp.sum(acc_ref[...], axis=1, keepdims=True)


def base_model_loss(x: jax.Array, w: jax.Array, *,
                    tm: int = 64, tn: int = 256, tk: int = 128) -> jax.Array:
    """mean(x @ w) with x:(M,H), w:(H,V).  Inputs are cast to bf16 for the MXU.

    For production shapes use 256-multiples for tn/tk on v6e/v7x (2x256x256
    MXU), larger tiles on v5e/v6e (128 MiB VMEM), and re-budget tiles for
    v7x's 64 MiB VMEM; vmem_limit_bytes is set explicitly below.
    """
    M, H = x.shape
    H2, V = w.shape
    assert H == H2
    tm, tn, tk = min(tm, M), min(tn, V), min(tk, H)
    assert M % tm == 0 and V % tn == 0 and H % tk == 0

    x = x.astype(jnp.bfloat16)
    w = w.astype(jnp.bfloat16)

    row_sums = pl.pallas_call(
        _loss_kernel,
        out_shape=jax.ShapeDtypeStruct((M, 1), jnp.float32),
        grid=(M // tm, V // tn, H // tk),
        in_specs=[pl.BlockSpec((tm, tk), lambda i, j, k: (i, k)),
                  pl.BlockSpec((tk, tn), lambda i, j, k: (k, j))],
        out_specs=pl.BlockSpec((tm, 1), lambda i, j, k: (i, 0)),
        scratch_shapes=[pltpu.VMEM((tm, tn), jnp.float32)],
        compiler_params=pltpu.CompilerParams(
            dimension_semantics=("parallel", "arbitrary", "arbitrary"),
            vmem_limit_bytes=32 * 1024 * 1024),
    )(x, w)
    return jnp.sum(row_sums) / (M * V)


# ----------------------------------------------------------------------------
# SkilledMixin forward (skilled_variant='learned', add_prior=True, training)
# ----------------------------------------------------------------------------
def skilled_mixin_forward(input_ids, task_ids, params):
    # task_ids = task_ids.long(); inform_layers(...) -> adapter classes are
    # external; task conditioning is a no-op in this synthetic setup.
    del task_ids

    embed = params["embed"]                        # (V, H)
    w_out = params["w_out"]                        # (H, V)
    x = embed[input_ids.reshape(-1)].astype(jnp.bfloat16)   # (B*S, H), bf16
    loss = base_model_loss(x, w_out)

    # aux_loss = [neg_log_IBP(p) for 'skill_logits' params]; loss += sum
    sl = params["skill_logits"]
    if isinstance(sl, (list, tuple)):
        sl = jnp.stack(sl)
    priors = ibp_priors(sl)                        # (L,), single kernel launch
    return loss + jnp.sum(priors)


# ----------------------------------------------------------------------------
# Pure-JAX references (correctness checks)
# ----------------------------------------------------------------------------
def ibp_prior_ref(matrix):
    N, K = matrix.shape
    s = jax.nn.sigmoid(matrix)
    Z = (s > 0.5).astype(jnp.float32)
    eq = jnp.all(Z[:, :, None] == Z[:, None, :], axis=0)
    count = jnp.sum(eq.astype(jnp.float32), axis=1)
    logp = -jnp.sum(lax.lgamma(count + 1.0) / count)
    m = jnp.sum(Z, axis=0)
    contrib = lax.lgamma(N - m + 1.0) + lax.lgamma(m)
    logp = logp + jnp.sum(jnp.where(m > 0, contrib, 0.0))
    return -logp


if __name__ == "__main__":
    key = jax.random.PRNGKey(0)
    k1, k2, k3, k4 = jax.random.split(key, 4)

    # SkilledMixin config (small, but large enough to exercise the tiled grid)
    n_tasks, n_skills, n_layers = 8, 8, 2
    B, S, V, H = 2, 64, 512, 256            # M = B*S = 128

    params = {
        "embed": jax.random.normal(k1, (V, H), jnp.float32) * 0.02,
        "w_out": jax.random.normal(k2, (H, V), jnp.float32) * 0.02,
        # stacked skill_logits of two adapter layers: (L, n_tasks, n_skills)
        "skill_logits": jax.random.normal(
            k3, (n_layers, n_tasks, n_skills), jnp.float32),
    }
    input_ids = jax.random.randint(k4, (B, S), 0, V, dtype=jnp.int32)
    task_ids = jnp.arange(B, dtype=jnp.int32)

    loss = skilled_mixin_forward(input_ids, task_ids, params)
    jax.block_until_ready(loss)

    # --- verify the batched IBP kernel against the pure-JAX reference --------
    got_priors = ibp_priors(params["skill_logits"])
    want_priors = jnp.stack([ibp_prior_ref(p) for p in params["skill_logits"]])
    assert jnp.allclose(got_priors, want_priors, atol=1e-4, rtol=1e-4), (
        got_priors, want_priors)

    # --- verify the tiled loss kernel against a plain-JAX matmul -------------
    x_bf16 = params["embed"][input_ids.reshape(-1)].astype(jnp.bfloat16)
    w_bf16 = params["w_out"].astype(jnp.bfloat16)
    got_loss = base_model_loss(x_bf16, w_bf16)
    want_loss = jnp.mean(jnp.dot(x_bf16.astype(jnp.float32),
                                 w_bf16.astype(jnp.float32)))
    assert jnp.allclose(got_loss, want_loss, atol=1e-4), (got_loss, want_loss)

    # --- full forward ---------------------------------------------------------
    want_total = want_loss + jnp.sum(want_priors)
    assert jnp.allclose(loss, want_total, atol=1e-3, rtol=1e-4), (loss, want_total)

    print("KERNEL_OK")
</pallas_src>

<mosaic_0001>
module attributes {stable_mosaic.version = 11 : i64} {
  func.func @_loss_kernel(%arg0: i32, %arg1: i32, %arg2: i32, %arg3: memref<64x128xbf16, #tpu.memory_space<vmem>>, %arg4: memref<128x256xbf16, #tpu.memory_space<vmem>>, %arg5: memref<64x1xf32, #tpu.memory_space<vmem>>, %arg6: memref<64x256xf32, #tpu.memory_space<vmem>>) attributes {dimension_semantics = [#tpu.dimension_semantics<parallel>, #tpu.dimension_semantics<arbitrary>, #tpu.dimension_semantics<arbitrary>], iteration_bounds = array<i64: 2, 2, 2>, scalar_prefetch = 0 : i64, scratch_operands = 1 : i64, tpu.core_type = #tpu.core_type<tc>, window_params = [{transform_indices = @transform_0, window_bounds = array<i64: 64, 128>}, {transform_indices = @transform_1, window_bounds = array<i64: 128, 256>}, {transform_indices = @transform_2, window_bounds = array<i64: 64, 1>}]} {
    %c0_i32 = arith.constant 0 : i32
    %0 = arith.cmpi eq, %arg2, %c0_i32 : i32
    %1 = arith.extui %0 : i1 to i32
    %c0_i32_0 = arith.constant 0 : i32
    %2 = arith.cmpi ne, %1, %c0_i32_0 : i32
    scf.if %2 {
      %cst_12 = arith.constant 0.000000e+00 : f32
      %17 = vector.broadcast %cst_12 : f32 to vector<64x256xf32>
      %c0_13 = arith.constant 0 : index
      %c0_14 = arith.constant 0 : index
      %18 = vector.load %arg6[%c0_13, %c0_14] : memref<64x256xf32, #tpu.memory_space<vmem>>, vector<64x256xf32>
      tpu.vector_store %arg6[%c0_13, %c0_14], %17 {strides = array<i32>} : memref<64x256xf32, #tpu.memory_space<vmem>>, vector<64x256xf32>,
    } else {
    }
    %c0_i32_1 = arith.constant 0 : i32
    %3 = arith.cmpi eq, %arg1, %c0_i32_1 : i32
    %c0_i32_2 = arith.constant 0 : i32
    %4 = arith.cmpi eq, %arg2, %c0_i32_2 : i32
    %5 = arith.andi %3, %4 : i1
    %6 = arith.extui %5 : i1 to i32
    %c0_i32_3 = arith.constant 0 : i32
    %7 = arith.cmpi ne, %6, %c0_i32_3 : i32
    scf.if %7 {
      %cst_12 = arith.constant 0.000000e+00 : f32
      %17 = vector.broadcast %cst_12 : f32 to vector<64x1xf32>
      %c0_13 = arith.constant 0 : index
      %c0_14 = arith.constant 0 : index
      %18 = vector.load %arg5[%c0_13, %c0_14] : memref<64x1xf32, #tpu.memory_space<vmem>>, vector<64x1xf32>
      tpu.vector_store %arg5[%c0_13, %c0_14], %17 {strides = array<i32>} : memref<64x1xf32, #tpu.memory_space<vmem>>, vector<64x1xf32>,
    } else {
    }
    %c0 = arith.constant 0 : index
    %c0_4 = arith.constant 0 : index
    %8 = vector.load %arg6[%c0, %c0_4] : memref<64x256xf32, #tpu.memory_space<vmem>>, vector<64x256xf32>
    %c0_5 = arith.constant 0 : index
    %c0_6 = arith.constant 0 : index
    %9 = vector.load %arg3[%c0_5, %c0_6] : memref<64x128xbf16, #tpu.memory_space<vmem>>, vector<64x128xbf16>
    %c0_7 = arith.constant 0 : index
    %c0_8 = arith.constant 0 : index
    %10 = vector.load %arg4[%c0_7, %c0_8] : memref<128x256xbf16, #tpu.memory_space<vmem>>, vector<128x256xbf16>
    %cst = arith.constant dense<0.000000e+00> : vector<64x256xf32>
    %11 = tpu.matmul %9, %10, %cst {dimension_numbers = #tpu.dot_dimension_numbers<[1], [0], [0], [1], [0, 0, 1, 1], [], []>} : vector<64x128xbf16>, vector<128x256xbf16>, vector<64x256xf32> -> vector<64x256xf32>
    %12 = arith.addf %8, %11 : vector<64x256xf32>
    %c0_9 = arith.constant 0 : index
    %c0_10 = arith.constant 0 : index
    %13 = vector.load %arg6[%c0_9, %c0_10] : memref<64x256xf32, #tpu.memory_space<vmem>>, vector<64x256xf32>
    tpu.vector_store %arg6[%c0_9, %c0_10], %12 {strides = array<i32>} : memref<64x256xf32, #tpu.memory_space<vmem>>, vector<64x256xf32>,
    %c1_i32 = arith.constant 1 : i32
    %14 = arith.cmpi eq, %arg2, %c1_i32 : i32
    %15 = arith.extui %14 : i1 to i32
    %c0_i32_11 = arith.constant 0 : i32
    %16 = arith.cmpi ne, %15, %c0_i32_11 : i32
    scf.if %16 {
      %c0_12 = arith.constant 0 : index
      %c0_13 = arith.constant 0 : index
      %17 = vector.load %arg5[%c0_12, %c0_13] : memref<64x1xf32, #tpu.memory_space<vmem>>, vector<64x1xf32>
      %c0_14 = arith.constant 0 : index
      %c0_15 = arith.constant 0 : index
      %18 = vector.load %arg6[%c0_14, %c0_15] : memref<64x256xf32, #tpu.memory_space<vmem>>, vector<64x256xf32>
      %cst_16 = arith.constant dense<0.000000e+00> : vector<64xf32>
      %19 = vector.multi_reduction <add>, %18, %cst_16 [1] : vector<64x256xf32> to vector<64xf32>
      %20 = vector.shape_cast %19 : vector<64xf32> to vector<64x1xf32>
      %21 = arith.addf %17, %20 : vector<64x1xf32>
      %c0_17 = arith.constant 0 : index
      %c0_18 = arith.constant 0 : index
      %22 = vector.load %arg5[%c0_17, %c0_18] : memref<64x1xf32, #tpu.memory_space<vmem>>, vector<64x1xf32>
      tpu.vector_store %arg5[%c0_17, %c0_18], %21 {strides = array<i32>} : memref<64x1xf32, #tpu.memory_space<vmem>>, vector<64x1xf32>,
    } else {
    }
    return
  }
  func.func @transform_0(%arg0: i32, %arg1: i32, %arg2: i32) -> (i32, i32) {
    %c0_i32 = arith.constant 0 : i32
    return %arg0, %arg2 : i32, i32
  }
  func.func @transform_1(%arg0: i32, %arg1: i32, %arg2: i32) -> (i32, i32) {
    %c0_i32 = arith.constant 0 : i32
    return %arg2, %arg1 : i32, i32
  }
  func.func @transform_2(%arg0: i32, %arg1: i32, %arg2: i32) -> (i32, i32) {
    %c0_i32 = arith.constant 0 : i32
    %c0_i32_0 = arith.constant 0 : i32
    return %arg0, %c0_i32 : i32, i32
  }
}

</mosaic_0001>

<bundles_post_ra>
// kernel: tpu_custom_call.1
= control target key start
LH: loop header
LB: loop body
LE: loop exit
PB: predicated region body
PF: predicated region fallthrough
CT: control target
= control target key end

     0   :  { %s1474_s0 = inlined_call_operand.hbm [shape: bf16[128,256], index: 0, kind: input, shape index: {}]   ;;  %s1475_s1 = inlined_call_operand.hbm [shape: bf16[256,512], index: 1, kind: input, shape index: {}]   ;;  %s1476_s2 = inlined_call_operand.vmem [shape: f32[128,1], index: 2, kind: output, shape index: {}]  }
   0x1   :  { %1488 = sst [smem:[#allocation15_spill]] %s1474_s0 }
   0x2   :  { %1489 = sst [smem:[#allocation16_spill]] %s1476_s2 }
   0x3   :  { %7 = vsyncpa [#allocation4], 0 }
   0x4   :  { %9 = vsyncpa [#allocation4 + $0x1], 0 }
   0x5   :  { %10 = vsyncpa [#allocation6], 0 }
   0x6   :  { %12 = vsyncpa [#allocation6 + $0x1], 0  ;;  %s1111_s9 = smov 0   ;;  %s1113_s10 = smov 0  }
   0x7   :  { %s1115_s11 = smov 0   ;;  %s1117_s12 = smov 0  }
   0x8   :  { %s1119_s13 = smov 0   ;;  %s1121_s14 = smov 0  }
   0x9   :  { %s1123_s15 = smov 0   ;;  %s1125_s16 = smov 0  }
   0xa   :  { %s1127_s17 = smov 0   ;;  %s1129_s18 = smov 0  }
   0xb   :  { %s1131_s19 = smov 0   ;;  %s1133_s20 = smov 0  }
   0xc   :  { %s1135_s21 = smov 0  }
   0xd LB: > { %1490 = sst [smem:[#allocation9_spill]] %s1060_s15  ;;  %s702_s22 = sadd.s32 4294967295, %s1084_s21   ;;  %s1084_s21 = sphi %s1135_s21, %s18_s21   ;;  %s1080_s20 = sphi %s1133_s20, %s1536_s20   ;;  %s1076_s19 = sphi %s1131_s19, %s1535_s19   ;;  %s1072_s18 = sphi %s1129_s18, %s1534_s18   ;;  %s1068_s17 = sphi %s1127_s17, %s1533_s17   ;;  %s1064_s16 = sphi %s1125_s16, %s1532_s16   ;;  %s1060_s15 = sphi %s1123_s15, %s1531_s15   ;;  %s1056_s14 = sphi %s1121_s14, %s1530_s14   ;;  %s1052_s13 = sphi %s1119_s13, %s1529_s13   ;;  %s1048_s12 = sphi %s1117_s12, %s1528_s12   ;;  %s1044_s11 = sphi %s1115_s11, %s1527_s11   ;;  %s1040_s10 = sphi %s1113_s10, %s1526_s10   ;;  %s1036_s9 = sphi %s1111_s9, %s1525_s9  }
   0xe   : > { %1491 = sst [smem:[#allocation10_spill]] %s1064_s16  ;;  %s30_s23 = sadd.s32 1, %s1072_s18 }
   0xf   : > { %1492 = sst [smem:[#allocation11_spill]] %s1068_s17  ;;  %p1176_p0 = scmp.ge.s32.totalorder %s30_s23, 2 }
  0x10   : > { %p53_p1 = scmp.ne.s32.totalorder %s1056_s14, %s1052_s13  ;;  %p1478_p2 = scmp.eq.s32.totalorder %s1084_s21, 0 }
  0x11   : > { %s1538_s23 = smov (%p1176_p0, %s30_s23), 0  ;;  %p59_p3 = scmp.ne.s32.totalorder %s1052_s13, %s1048_s12 }
  0x12   : > { %1494 = sst [smem:[#allocation12_spill]] %s1538_s23  ;;  %s1192_s27 = ssub.s32 %s1072_s18, %s1538_s23 }
  0x13   : > { %p1194_p4 = scmp.eq.s32.totalorder %s702_s22, 0  ;;  %p55_p5 = por %p1478_p2, %p53_p1 }
  0x14   : > { %p1477_p7 = scmp.lt.s32.totalorder %s1084_s21, 8  ;;  %s137_s30 = sand.u32 1, %s1056_s14  }
  0x15   : > { %s1495_s28 = scalar_select %p1194_p4, 1, 0 }
  0x16   : > { %p1202_p6 = por %p1194_p4, %p59_p3  ;;  %s744_s3 = sshll.u32 %s1080_s20, 4 }
  0x17   : > { %s706_s4 = sshll.u32 %s137_s30, 5  ;;  %s147_s5 = sadd.s32 %s1072_s18, %s744_s3 }
  0x18   : > { %s1496_s29 = scalar_select %p1202_p6, 1, 0 }
  0x19   : > { %s709_s6 = sshll.u32 %s147_s5, 6  ;;  %s141_s7 = scalar_lea.vmem [#allocation3], %s706_s4 }
  0x1a   : > { %s150_s8 = sshll.u32 %s141_s7, 4  ;;  %s1497_s0 = sld [smem:[#allocation15_spill]]  ;;  %s1215_s8 = int_to_ptr.vmem [resolvable:$true] %s150_s8 }
  0x1b   : > { %p1219_p8 = pnand %p1477_p7, %p55_p5  ;;  %s1224_s3 = scalar_lea.sflag [#allocation4], %s137_s30 }
  0x1d   : > { %p916_p11 = pneg %p1219_p8 }
  0x20   : > { %s1213_s26 = scalar_lea.hbm %s1497_s0, %s709_s6  ;;  %s919_s7 = scalar_lea.hbm %s1497_s0, 2048 }
  0x21   : > { %s914_s4 = scalar_lea.hbm %s1213_s26, 512  ;;  %p920_p1 = scmp.lt.u32.totalorder %s1213_s26, %s1497_s0 }
  0x22   : > { %p915_p10 = scmp.ne.s32.totalorder %s1213_s26, %s914_s4  ;;  %p921_p3 = scmp.lt.u32.totalorder %s919_s7, %s914_s4 }
  0x23   : > { %p923_p7 = scmp.lt.u32.totalorder %s914_s4, %s1213_s26 }
  0x24   : > { %p917_p12 = pnand %p916_p11, %p915_p10  ;;  %p922_p5 = por %p921_p3, %p920_p1 }
  0x26   : > { %p918_p13 = pneg %p917_p12  ;;  %p924_p2 = por %p923_p7, %p922_p5 }
  0x28   : > { %p925_p9 = pnand %p924_p2, %p918_p13 }
  0x2a   : > { %928 = shalt.err (!%p925_p9)
}
  0x2b   : > { %s929_s30 = scalar_lea.vmem %s1215_s8, 512  ;;  %s1086_s5 = smov [#allocation3]  }
  0x2c   : > { %p930_p10 = scmp.ne.s32.totalorder %s1215_s8, %s929_s30  ;;  %s934_s6 = sshll.u32 %s1086_s5, 4  ;;  %s935_s6 = int_to_ptr.vmem [resolvable:$false] %s934_s6 }
  0x2d   : > { %s936_s12 = scalar_lea.vmem %s935_s6, 1024  ;;  %p937_p4 = scmp.lt.s32.totalorder %s1215_s8, %s935_s6 }
  0x2e   : > { %p932_p12 = pnand %p930_p10, %p916_p11  ;;  %p938_p1 = scmp.lt.s32.totalorder %s936_s12, %s929_s30 }
  0x30   : > { %p933_p6 = pneg %p932_p12  ;;  %p939_p3 = por %p938_p1, %p937_p4 }
  0x32   : > { %p940_p7 = pnand %p939_p3, %p933_p6 }
  0x34   : > { %943 = shalt.err (!%p940_p7)
}
  0x35   : > { %s1481_s4 = smov 128   ;;  %s1088_s7 = smov 64  }
  0x36   : > { %s1089_s22 = smov 4   ;;  %p182_p2 = scmp.lt.s32.totalorder %s1084_s21, 9 }
  0x37   : > { %769 = dma.hbm_to_vmem [thread:$0]  (!%p1219_p8), %s1213_s26, 512, %s1215_s8, %s1224_s3, %s1481_s4, %s1088_s7, %s1089_s22  }
  0x38   : > { %p1499_p4 = scmp.ge.s32.totalorder %s1084_s21, 1  ;;  %s33_s5 = sadd.s32 1, %s1076_s19 }
  0x39   : > { %s74_s6 = sadd.s32 1, %s1044_s11  ;;  %s1540_s5 = smov (!%p1176_p0, %s33_s5), %s1076_s19 }
  0x3a   : > { %p1256_p6 = pnand %p1499_p4, %p182_p2  ;;  %p81_p9 = scmp.ne.s32.totalorder %s1044_s11, %s1040_s10 }
  0x3b   : > { %p87_p11 = scmp.ne.s32.totalorder %s1040_s10, %s1036_s9  ;;  %p35_p13 = scmp.ge.s32.totalorder %s1540_s5, 2 }
  0x3c   : > { %s160_s25 = sand.u32 1, %s1044_s11   ;;  %p1501_p8 = scmp.eq.s32.totalorder %s1084_s21, 0 }
  0x3d   : > { %p1503_p10 = scmp.ne.s32.totalorder %s1495_s28, 0  ;;  %s1542_s5 = smov (%p35_p13, %s1540_s5), 0 }
  0x3e   : > { %p1272_p5 = por %p81_p9, %p1501_p8  ;;  %1506 = sst [smem:[#allocation14_spill]] %s1542_s5 }
  0x3f   : > { %p1278_p12 = por %p87_p11, %p1503_p10  ;;  %s1507_s24 = sadd.s32 1, %s1080_s20 }
  0x40   : > { %s1544_s24 = smov (!%p35_p13, %s1507_s24), %s1080_s20  ;;  %s70_s9 = ssub.s32 %s1076_s19, %s1542_s5 }
  0x41   : > { %s1504_s8 = scalar_select %p1278_p12, 1, 0 }
  0x42   : > { %p39_p0 = scmp.ge.s32.totalorder %s1544_s24, 2  ;;  %s71_s3 = sor.u32 %s70_s9, %s1192_s27 }
  0x43   : > { %1505 = sst [smem:[#allocation13_spill]] %s1504_s8  ;;  %p72_p1 = scmp.eq.s32.totalorder %s71_s3, 0 }
  0x44   : > { %s710_s12 = sshll.u32 %s160_s25, 7  ;;  %s1546_s24 = smov (%p39_p0, %s1544_s24), 0 }
  0x45   : > { %s1293_s28 = scalar_select %p72_p1, %s1044_s11, %s74_s6  }
  0x46   : > { %s41_s7 = ssub.s32 %s1080_s20, %s1546_s24  ;;  %s712_s4 = sshll.u32 %s1076_s19, 1 }
  0x47   : > { %s43_s22 = sor.u32 %s1192_s27, %s41_s7  ;;  %s745_s0 = sshll.u32 %s1072_s18, 6 }
  0x48   : > { %p44_p3 = scmp.eq.s32.totalorder %s43_s22, 0  ;;  %s171_s23 = sadd.s32 %s745_s0, %s712_s4 }
  0x49   : > { %s164_s16 = scalar_lea.vmem [#allocation5], %s710_s12  ;;  %s1508_s5 = sadd.s32 1, %s1056_s14 }
  0x4a   : > { %s174_s2 = sshll.u32 %s164_s16, 4  ;;  %s714_s9 = sshll.u32 %s171_s23, 6  ;;  %s1305_s2 = int_to_ptr.vmem [resolvable:$true] %s174_s2 }
  0x4b   : > { %s1303_s15 = scalar_select %p44_p3, %s1056_s14, %s1508_s5  }
  0x4c   : > { %s1310_s8 = scalar_lea.hbm %s1475_s1, %s714_s9  ;;  %p1509_p7 = scmp.lt.s32.totalorder %s1084_s21, 8 }
  0x4d   : > { %s1320_s16 = scalar_lea.sflag [#allocation6], %s160_s25  ;;  %s944_s23 = scalar_lea.hbm %s1310_s8, 2048 }
  0x4e   : > { %p1316_p2 = pnand %p1509_p7, %p1272_p5  ;;  %p945_p4 = scmp.ne.s32.totalorder %s1310_s8, %s944_s23 }
  0x4f   : > { %s949_s4 = scalar_lea.hbm %s1475_s1, 8192  ;;  %p950_p8 = scmp.lt.u32.totalorder %s1310_s8, %s1475_s1 }
  0x50   : > { %p946_p9 = pneg %p1316_p2  ;;  %p951_p5 = scmp.lt.u32.totalorder %s949_s4, %s944_s23 }
  0x51   : > { %p953_p0 = scmp.lt.u32.totalorder %s944_s23, %s1310_s8 }
  0x52   : > { %p947_p11 = pnand %p946_p9, %p945_p4  ;;  %p952_p10 = por %p951_p5, %p950_p8 }
  0x54   : > { %p948_p13 = pneg %p947_p11  ;;  %p954_p1 = por %p953_p0, %p952_p10 }
  0x56   : > { %p955_p3 = pnand %p954_p1, %p948_p13 }
  0x58   : > { %958 = shalt.err (!%p955_p3)
}
  0x59   : > { %s959_s25 = scalar_lea.vmem %s1305_s2, 2048  ;;  %s1090_s26 = smov [#allocation5]  }
  0x5a   : > { %p960_p7 = scmp.ne.s32.totalorder %s1305_s2, %s959_s25  ;;  %s964_s12 = sshll.u32 %s1090_s26, 4  ;;  %s965_s12 = int_to_ptr.vmem [resolvable:$false] %s964_s12 }
  0x5b   : > { %s966_s7 = scalar_lea.vmem %s965_s12, 4096  ;;  %p967_p12 = scmp.lt.s32.totalorder %s1305_s2, %s965_s12 }
  0x5c   : > { %p962_p4 = pnand %p960_p7, %p946_p9  ;;  %p968_p8 = scmp.lt.s32.totalorder %s966_s7, %s959_s25 }
  0x5e   : > { %p963_p11 = pneg %p962_p4  ;;  %p969_p5 = por %p968_p8, %p967_p12 }
  0x60   : > { %p970_p10 = pnand %p969_p5, %p963_p11 }
  0x62   : > { %973 = shalt.err (!%p970_p10)
}
  0x63   : > { %s1091_s22 = smov 256   ;;  %s1092_s9 = smov 8  }
  0x64   : > { %s1511_s3 = smov 128   ;;  %186 = sbr.rel (%p1256_p6) target bundleno = 576 (0x240), region = 28 }
  0x65   : > { %772 = dma.hbm_to_vmem [thread:$0]  (!%p1316_p2), %s1310_s8, 2048, %s1305_s2, %s1320_s16, %s1091_s22, %s1511_s3, %s1092_s9  }
  0x66   : > { %s188_s23 = sand.u32 (!%p1256_p6), 1, %s1052_s13   ;;  %p1512_p12 = scmp.ne.s32.totalorder (!%p1256_p6), %s1496_s29, 0 }
  0x67   : > { %s716_s17 = sshll.u32 (!%p1256_p6), %s188_s23, 5  ;;  %s189_s27 = scalar_lea.sflag (!%p1256_p6), [#allocation4], %s188_s23 }
  0x68   : > { %s1352_s4 = scalar_lea.vmem (!%p1256_p6), [#allocation3], %s716_s17 }
  0x6b   : > { %1027 = dma.done.wait (%p1512_p12), %s189_s27, 512  }
  0x6c   : > { %1029 = vsyncadd (%p1512_p12), %s189_s27, 4294966784  ;;  %s1513_s5 = sld [smem:[#allocation13_spill]]  ;;  %s197_s0 = sand.u32 1, %s1040_s10  }
  0x6d   : > { %s717_s6 = sshll.u32 %s197_s0, 7  ;;  %s198_s2 = scalar_lea.sflag [#allocation6], %s197_s0 }
  0x6e   : > { %s1359_s8 = scalar_lea.vmem [#allocation5], %s717_s6 }
  0x72   : > { %p1514_p6 = scmp.ne.s32.totalorder %s1513_s5, 0 }
  0x74   : > { %1031 = dma.done.wait (%p1514_p6), %s198_s2, 2048  }
  0x75   : > { %1033 = vsyncadd (%p1514_p6), %s198_s2, 4294965248  ;;  %s1515_s30 = sld [smem:[#allocation11_spill]]  ;;  %s1516_s16 = sld [smem:[#allocation9_spill]] }
  0x76   : > { %s1517_s7 = sld [smem:[#allocation16_spill]] }
  0x7b   : > { %s718_s25 = sshll.u32 %s1515_s30, 3  ;;  %p237_p2 = scmp.eq.s32.totalorder %s1516_s16, 0 }
  0x7c   : > { %p231_p9 = scmp.lt.s32.totalorder %s718_s25, 15  ;;  %p720_p13 = scmp.ne.s32.totalorder %s1516_s16, 0 }
  0x7d   : > { %v1093_v0 = vmov (!%p720_p13), 0.0  }
  0x7e   : > { %s1548_s25 = smov (!%p231_p9, %s718_s25), 15  ;;  %240 = sbr.rel (%p720_p13) target bundleno = 135 (0x87), region = 40 }
  0x7f   : > { %s719_s29 = sshll.u32 %s1548_s25, 3  ;;  %241 = vst [vmem:[#allocation2] sm:$0xff] (!%p720_p13), %v1093_v0  ;;  %242 = vst [vmem:[#allocation2 + $0x8] sm:$0xff] (!%p720_p13), %v1093_v0 }
  0x80   : > { %s1370_s22 = scalar_lea.vmem %s1517_s7, %s719_s29  ;;  %243 = vst [vmem:[#allocation2 + $0x10] sm:$0xff] (!%p720_p13), %v1093_v0  ;;  %244 = vst [vmem:[#allocation2 + $0x18] sm:$0xff] (!%p720_p13), %v1093_v0 }
  0x81   : > { %245 = vst [vmem:[#allocation2 + $0x20] sm:$0xff] (!%p720_p13), %v1093_v0  ;;  %246 = vst [vmem:[#allocation2 + $0x28] sm:$0xff] (!%p720_p13), %v1093_v0 }
  0x82   : > { %247 = vst [vmem:[#allocation2 + $0x30] sm:$0xff] (!%p720_p13), %v1093_v0  ;;  %248 = vst [vmem:[#allocation2 + $0x38] sm:$0xff] (!%p720_p13), %v1093_v0 }
  0x83   : > { %249 = vst [vmem:[#allocation2 + $0x40] sm:$0xff] (!%p720_p13), %v1093_v0  ;;  %250 = vst [vmem:[#allocation2 + $0x48] sm:$0xff] (!%p720_p13), %v1093_v0 }
  0x84   : > { %251 = vst [vmem:[#allocation2 + $0x50] sm:$0xff] (!%p720_p13), %v1093_v0  ;;  %252 = vst [vmem:[#allocation2 + $0x58] sm:$0xff] (!%p720_p13), %v1093_v0 }
  0x85   : > { %253 = vst [vmem:[#allocation2 + $0x60] sm:$0xff] %v1093_v0  ;;  %254 = vst [vmem:[#allocation2 + $0x68] sm:$0xff] %v1093_v0 }
  0x86   : > { %255 = vst [vmem:[#allocation2 + $0x70] sm:$0xff] %v1093_v0  ;;  %256 = vst [vmem:[#allocation2 + $0x78] sm:$0xff] %v1093_v0 }
  0x87 PF: > { %s1518_s9 = sld [smem:[#allocation10_spill]] }
  0x8d   : > { %p257_p0 = scmp.eq.s32.totalorder %s1518_s9, 0 }
  0x8f   : > { %p258_p1 = pnand %p257_p0, %p237_p2 }
  0x90   : > { %vm262_vm0 = vcmask (!%p258_p1), 7168   ;;  %v1094_v1 = vmov (!%p258_p1), 0.0  }
  0x91   : > { %261 = sbr.rel (%p258_p1) target bundleno = 152 (0x98), region = 44  ;;  %263 = vst.msk [vmem:[%s1370_s22] sm:$0xff] (!%p258_p1), %vm262_vm0, %v1094_v1  ;;  %264 = vst.msk [vmem:[%s1370_s22 + $0x8] sm:$0xff] (!%p258_p1), %vm262_vm0, %v1094_v1 }
  0x92   : > { %265 = vst.msk [vmem:[%s1370_s22 + $0x10] sm:$0xff] (!%p258_p1), %vm262_vm0, %v1094_v1  ;;  %266 = vst.msk [vmem:[%s1370_s22 + $0x18] sm:$0xff] (!%p258_p1), %vm262_vm0, %v1094_v1 }
  0x93   : > { %267 = vst.msk [vmem:[%s1370_s22 + $0x20] sm:$0xff] (!%p258_p1), %vm262_vm0, %v1094_v1  ;;  %268 = vst.msk [vmem:[%s1370_s22 + $0x28] sm:$0xff] (!%p258_p1), %vm262_vm0, %v1094_v1 }
  0x94   : > { %269 = vst.msk [vmem:[%s1370_s22 + $0x30] sm:$0xff] (!%p258_p1), %vm262_vm0, %v1094_v1  ;;  %270 = vst.msk [vmem:[%s1370_s22 + $0x38] sm:$0xff] (!%p258_p1), %vm262_vm0, %v1094_v1 }
  0x98 PF: > { %v886_v2 = vld [vmem:[%s1359_s8 + $0x4] ss:$8 sps:$4 sm:$0xff]   ;;  %v888_v3 = vld [vmem:[%s1359_s8] ss:$8 sps:$4 sm:$0xff]   ;;  %v1095_v4 = vmov 0   ;;  %v911_v20 = vld [vmem:[%s1352_s4 + $0x10] sm:$0xff]  }
  0x99   : > { %447 = vmatprep.mubr.bf16.mxu0 %v1095_v4  ;;  %467 = vmatprep.mubr.bf16.mxu1 %v1095_v4  ;;  %v889_v5 = vld [vmem:[%s1359_s8 + $0x14] ss:$8 sps:$4 sm:$0xff]   ;;  %v891_v6 = vld [vmem:[%s1359_s8 + $0x10] ss:$8 sps:$4 sm:$0xff]   ;;  %v892_v7 = vld [vmem:[%s1359_s8 + $0x24] ss:$8 sps:$4 sm:$0xff]  }
  0x9a   : > { %415 = vmatprep.subr.bf16.mxu0 %v886_v2  ;;  %746 = vmatprep.subr.bf16.mxu1 %v886_v2  ;;  %v894_v8 = vld [vmem:[%s1359_s8 + $0x20] ss:$8 sps:$4 sm:$0xff]   ;;  %v895_v9 = vld [vmem:[%s1359_s8 + $0x34] ss:$8 sps:$4 sm:$0xff]   ;;  %v897_v10 = vld [vmem:[%s1359_s8 + $0x30] ss:$8 sps:$4 sm:$0xff]  }
  0x9b   : > { %416 = vmatpush1.bf16.msra.mxu0 %v888_v3  ;;  %754 = vmatpush1.bf16.msra.mxu1 %v888_v3  ;;  %v898_v11 = vld [vmem:[%s1359_s8 + $0x44] ss:$8 sps:$4 sm:$0xff]   ;;  %v900_v12 = vld [vmem:[%s1359_s8 + $0x40] ss:$8 sps:$4 sm:$0xff]   ;;  %v901_v13 = vld [vmem:[%s1359_s8 + $0x54] ss:$8 sps:$4 sm:$0xff]  }
  0x9c   : > { %417 = vmatprep.subr.bf16.mxu0 %v889_v5  ;;  %747 = vmatprep.subr.bf16.mxu1 %v889_v5  ;;  %v903_v14 = vld [vmem:[%s1359_s8 + $0x50] ss:$8 sps:$4 sm:$0xff]   ;;  %v904_v15 = vld [vmem:[%s1359_s8 + $0x64] ss:$8 sps:$4 sm:$0xff]   ;;  %v906_v16 = vld [vmem:[%s1359_s8 + $0x60] ss:$8 sps:$4 sm:$0xff]  }
  0x9d   : > { %v907_v17 = vld [vmem:[%s1359_s8 + $0x74] ss:$8 sps:$4 sm:$0xff]   ;;  %v909_v18 = vld [vmem:[%s1359_s8 + $0x70] ss:$8 sps:$4 sm:$0xff]   ;;  %v910_v19 = vld [vmem:[%s1352_s4] sm:$0xff]   ;;  %s1520_s23 = sld [smem:[#allocation9_spill]] }
  0x9e   : > { %v912_v21 = vld [vmem:[%s1352_s4 + $0x8] sm:$0xff]   ;;  %v913_v22 = vld [vmem:[%s1352_s4 + $0x18] sm:$0xff]   ;;  %v271_v23 = vld [vmem:[#allocation2] sm:$0xff] }
  0x9f   : > { %418 = vmatpush1.bf16.msra.mxu0 %v891_v6  ;;  %755 = vmatpush1.bf16.msra.mxu1 %v891_v6  ;;  %v279_v24 = vld [vmem:[#allocation2 + $0x40] sm:$0xff]  ;;  %v272_v25 = vld [vmem:[#allocation2 + $0x8] sm:$0xff]  ;;  %v273_v29 = vld [vmem:[#allocation2 + $0x10] sm:$0xff] }
  0xa0   : > { %419 = vmatprep.subr.bf16.mxu0 %v892_v7  ;;  %748 = vmatprep.subr.bf16.mxu1 %v892_v7  ;;  %v280_v26 = vld [vmem:[#allocation2 + $0x48] sm:$0xff]  ;;  %v281_v30 = vld [vmem:[#allocation2 + $0x50] sm:$0xff]  ;;  %v274_v35 = vld [vmem:[#allocation2 + $0x18] sm:$0xff] }
  0xa1   : > { %v282_v36 = vld [vmem:[#allocation2 + $0x58] sm:$0xff]  ;;  %v275_v47 = vld [vmem:[#allocation2 + $0x20] sm:$0xff]  ;;  %v276_v49 = vld [vmem:[#allocation2 + $0x28] sm:$0xff] }
  0xa2   : > { %v283_v48 = vld [vmem:[#allocation2 + $0x60] sm:$0xff]  ;;  %v284_v50 = vld [vmem:[#allocation2 + $0x68] sm:$0xff]  ;;  %v277_v53 = vld [vmem:[#allocation2 + $0x30] sm:$0xff] }
  0xa3   : > { %420 = vmatpush1.bf16.msra.mxu0 %v894_v8  ;;  %756 = vmatpush1.bf16.msra.mxu1 %v894_v8  ;;  %v285_v54 = vld [vmem:[#allocation2 + $0x70] sm:$0xff]  ;;  %v278_v59 = vld [vmem:[#allocation2 + $0x38] sm:$0xff]  ;;  %p741_p3 = scmp.ne.s32.totalorder %s1520_s23, 1 }
  0xa4   : > { %421 = vmatprep.subr.bf16.mxu0 %v895_v9  ;;  %749 = vmatprep.subr.bf16.mxu1 %v895_v9  ;;  %v286_v60 = vld [vmem:[#allocation2 + $0x78] sm:$0xff]  ;;  %vm580_vm1 = vcmask (!%p741_p3), 7168  }
  0xa7   : > { %422 = vmatpush1.bf16.msra.mxu0 %v897_v10  ;;  %757 = vmatpush1.bf16.msra.mxu1 %v897_v10 }
  0xa8   : > { %423 = vmatprep.subr.bf16.mxu0 %v898_v11  ;;  %750 = vmatprep.subr.bf16.mxu1 %v898_v11 }
  0xab   : > { %424 = vmatpush1.bf16.msra.mxu0 %v900_v12  ;;  %758 = vmatpush1.bf16.msra.mxu1 %v900_v12 }
  0xac   : > { %425 = vmatprep.subr.bf16.mxu0 %v901_v13  ;;  %751 = vmatprep.subr.bf16.mxu1 %v901_v13 }
  0xaf   : > { %426 = vmatpush1.bf16.msra.mxu0 %v903_v14  ;;  %759 = vmatpush1.bf16.msra.mxu1 %v903_v14 }
  0xb0   : > { %427 = vmatprep.subr.bf16.mxu0 %v904_v15  ;;  %752 = vmatprep.subr.bf16.mxu1 %v904_v15 }
  0xb3   : > { %428 = vmatpush1.bf16.msra.mxu0 %v906_v16  ;;  %760 = vmatpush1.bf16.msra.mxu1 %v906_v16 }
  0xb4   : > { %429 = vmatprep.subr.bf16.mxu0 %v907_v17  ;;  %753 = vmatprep.subr.bf16.mxu1 %v907_v17 }
  0xb7   : > { %430 = vmatpush1.bf16.msra.mxu0 %v909_v18  ;;  %761 = vmatpush1.bf16.msra.mxu1 %v909_v18 }
  0xba   : > { %448 = vmatmul.mubr.bf16.vlgmr.msra.gmra.mrb[0].mxu0 %v910_v19  ;;  %468 = vmatmul.mubr.bf16.vlgmr.msra.gmra.mrb[0].mxu1 %v911_v20 }
  0xbb   : > { %457 = vmatprep.mubr.bf16.mxu0 %v1095_v4  ;;  %477 = vmatprep.mubr.bf16.mxu1 %v1095_v4 }
  0xc2   : > { %458 = vmatmul.mubr.bf16.gmra.mrb[4].mxu0 %v912_v21  ;;  %478 = vmatmul.mubr.bf16.gmra.mrb[4].mxu1 %v913_v22 }
 0x18d   : > { %v449_v27 = vpop.f32.mrb[0].mxu0  ;;  %v469_v28 = vpop.f32.mrb[0].mxu1 }
 0x18e   : > { %v488_v31 = vadd.f32 %v449_v27, %v271_v23  ;;  %v496_v32 = vadd.f32 %v469_v28, %v279_v24  ;;  %v451_v33 = vpop.f32.mrb[1].mxu0  ;;  %v471_v34 = vpop.f32.mrb[1].mxu1 }
 0x18f   : > { %v489_v37 = vadd.f32 %v451_v33, %v272_v25  ;;  %v497_v38 = vadd.f32 %v471_v34, %v280_v26  ;;  %v453_v39 = vpop.f32.mrb[2].mxu0  ;;  %v473_v40 = vpop.f32.mrb[2].mxu1 }
 0x190   : > { %504 = vst [vmem:[#allocation2] sm:$0xff] %v488_v31  ;;  %512 = vst [vmem:[#allocation2 + $0x40] sm:$0xff] %v496_v32  ;;  %v490_v41 = vadd.f32 %v453_v39, %v273_v29  ;;  %v498_v42 = vadd.f32 %v473_v40, %v281_v30  ;;  %v455_v43 = vpop.f32.mrb[3].mxu0  ;;  %v475_v44 = vpop.f32.mrb[3].mxu1  ;;  %v526_v31 = vld [vmem:[%s1370_s22 + $0x10] sm:$0xff] (!%p741_p3)  ;;  %v524_v32 = vld [vmem:[%s1370_s22] sm:$0xff] (!%p741_p3) }
 0x191   : > { %505 = vst [vmem:[#allocation2 + $0x8] sm:$0xff] %v489_v37  ;;  %513 = vst [vmem:[#allocation2 + $0x48] sm:$0xff] %v497_v38  ;;  %v491_v45 = vadd.f32 %v455_v43, %v274_v35  ;;  %v499_v46 = vadd.f32 %v475_v44, %v282_v36  ;;  %v527_v37 = vld [vmem:[%s1370_s22 + $0x18] sm:$0xff] (!%p741_p3)  ;;  %v525_v38 = vld [vmem:[%s1370_s22 + $0x8] sm:$0xff] (!%p741_p3) }
 0x192   : > { %506 = vst [vmem:[#allocation2 + $0x10] sm:$0xff] %v490_v41  ;;  %514 = vst [vmem:[#allocation2 + $0x50] sm:$0xff] %v498_v42  ;;  %v529_v43 = vld [vmem:[%s1370_s22 + $0x28] sm:$0xff] (!%p741_p3)  ;;  %v528_v44 = vld [vmem:[%s1370_s22 + $0x20] sm:$0xff] (!%p741_p3) }
 0x193   : > { %507 = vst [vmem:[#allocation2 + $0x18] sm:$0xff] %v491_v45  ;;  %515 = vst [vmem:[#allocation2 + $0x58] sm:$0xff] %v499_v46 }
 0x195   : > { %v459_v51 = vpop.f32.mrb[4].mxu0  ;;  %v479_v52 = vpop.f32.mrb[4].mxu1  ;;  %523 = sbr.rel (%p741_p3) target bundleno = 576 (0x240), region = 48 }
 0x196   : > { %v492_v55 = vadd.f32 %v459_v51, %v275_v47  ;;  %v500_v56 = vadd.f32 %v479_v52, %v283_v48  ;;  %v461_v57 = vpop.f32.mrb[5].mxu0  ;;  %v481_v58 = vpop.f32.mrb[5].mxu1 }
 0x197   : > { %v493_v61 = vadd.f32 %v461_v57, %v276_v49  ;;  %v501_v62 = vadd.f32 %v481_v58, %v284_v50  ;;  %v463_v63 = vpop.f32.mrb[6].mxu0  ;;  %v483_v0 = vpop.f32.mrb[6].mxu1  ;;  %v532_v9 = vld [vmem:[#allocation2] sm:$0xff] (!%p741_p3)  ;;  %v531_v49 = vld [vmem:[%s1370_s22 + $0x38] sm:$0xff] (!%p741_p3)  ;;  %v530_v50 = vld [vmem:[%s1370_s22 + $0x30] sm:$0xff] (!%p741_p3) }
 0x198   : > { %508 = vst [vmem:[#allocation2 + $0x20] sm:$0xff] %v492_v55  ;;  %516 = vst [vmem:[#allocation2 + $0x60] sm:$0xff] %v500_v56  ;;  %v494_v1 = vadd.f32 %v463_v63, %v277_v53  ;;  %v502_v2 = vadd.f32 %v483_v0, %v285_v54  ;;  %v465_v3 = vpop.f32.mrb[7].mxu0  ;;  %v485_v4 = vpop.f32.mrb[7].mxu1  ;;  %v533_v11 = vld [vmem:[#allocation2 + $0x8] sm:$0xff] (!%p741_p3)  ;;  %v540_v21 = vld [vmem:[#allocation2 + $0x40] sm:$0xff] (!%p741_p3) }
 0x199   : > { %509 = vst [vmem:[#allocation2 + $0x28] sm:$0xff] %v493_v61  ;;  %517 = vst [vmem:[#allocation2 + $0x68] sm:$0xff] %v501_v62  ;;  %v495_v5 = vadd.f32 %v465_v3, %v278_v59  ;;  %v503_v6 = vadd.f32 %v485_v4, %v286_v60  ;;  %v548_v14 = vadd.f32 (!%p741_p3), %v533_v11, %v532_v9  ;;  %v534_v15 = vld [vmem:[#allocation2 + $0x10] sm:$0xff] (!%p741_p3)  ;;  %v541_v22 = vld [vmem:[#allocation2 + $0x48] sm:$0xff] (!%p741_p3) }
 0x19a   : > { %510 = vst [vmem:[#allocation2 + $0x30] sm:$0xff] %v494_v1  ;;  %518 = vst [vmem:[#allocation2 + $0x70] sm:$0xff] %v502_v2  ;;  %v535_v16 = vld [vmem:[#allocation2 + $0x18] sm:$0xff] (!%p741_p3)  ;;  %v542_v19 = vld [vmem:[#allocation2 + $0x50] sm:$0xff] (!%p741_p3)  ;;  %v560_v24 = vadd.f32 (!%p741_p3), %v541_v22, %v540_v21 }
 0x19b   : > { %511 = vst [vmem:[#allocation2 + $0x38] sm:$0xff] %v495_v5  ;;  %519 = vst [vmem:[#allocation2 + $0x78] sm:$0xff] %v503_v6  ;;  %549 = vadd.xlane.f32.xlu0 (!%p741_p3), %v548_v14  ;;  %v551_v18 = vadd.f32 (!%p741_p3), %v535_v16, %v534_v15  ;;  %v543_v20 = vld [vmem:[#allocation2 + $0x58] sm:$0xff] (!%p741_p3) }
 0x19c   : > { %v563_v23 = vadd.f32 %v543_v20, %v542_v19 }
 0x19f   : > { %v536_v7 = vld [vmem:[#allocation2 + $0x20] sm:$0xff]  ;;  %552 = vadd.xlane.f32.xlu0 %v551_v18 }
 0x1a0   : > { %v537_v8 = vld [vmem:[#allocation2 + $0x28] sm:$0xff]  ;;  %v544_v27 = vld [vmem:[#allocation2 + $0x60] sm:$0xff] }
 0x1a1   : > { %v554_v10 = vadd.f32 %v537_v8, %v536_v7  ;;  %v538_v12 = vld [vmem:[#allocation2 + $0x30] sm:$0xff]  ;;  %v545_v28 = vld [vmem:[#allocation2 + $0x68] sm:$0xff] }
 0x1a2   : > { %v539_v13 = vld [vmem:[#allocation2 + $0x38] sm:$0xff]  ;;  %v546_v25 = vld [vmem:[#allocation2 + $0x70] sm:$0xff]  ;;  %v566_v30 = vadd.f32 %v545_v28, %v544_v27 }
 0x1a3   : > { %555 = vadd.xlane.f32.xlu1 %v554_v10  ;;  %v557_v17 = vadd.f32 %v539_v13, %v538_v12  ;;  %v547_v26 = vld [vmem:[#allocation2 + $0x78] sm:$0xff]  ;;  %561 = vadd.xlane.f32.xlu0 %v560_v24 }
 0x1a4   : > { %v569_v29 = vadd.f32 %v547_v26, %v546_v25 }
 0x1a7   : > { %558 = vadd.xlane.f32.xlu1 %v557_v17  ;;  %567 = vadd.xlane.f32.xlu0 %v566_v30 }
 0x1ab   : > { %564 = vadd.xlane.f32.xlu1 %v563_v23 }
 0x1af   : > { %570 = vadd.xlane.f32.xlu1 %v569_v29 }
 0x228   : > { %v550_v35 = vpop.xlane.xlu0 %549 }
 0x229   : > { %v572_v36 = vadd.f32 %v550_v35, %v524_v32 }
 0x22b   : > { %581 = vst.msk [vmem:[%s1370_s22] sm:$0xff] %vm580_vm1, %v572_v36 }
 0x22c   : > { %v553_v41 = vpop.xlane.xlu0 %552 }
 0x22d   : > { %v573_v42 = vadd.f32 %v553_v41, %v525_v38 }
 0x22f   : > { %582 = vst.msk [vmem:[%s1370_s22 + $0x8] sm:$0xff] %vm580_vm1, %v573_v42 }
 0x230   : > { %v556_v33 = vpop.xlane.xlu1 %555  ;;  %v562_v47 = vpop.xlane.xlu0 %561 }
 0x231   : > { %v574_v34 = vadd.f32 %v556_v33, %v526_v31  ;;  %v576_v48 = vadd.f32 %v562_v47, %v528_v44 }
 0x233   : > { %583 = vst.msk [vmem:[%s1370_s22 + $0x10] sm:$0xff] %vm580_vm1, %v574_v34  ;;  %585 = vst.msk [vmem:[%s1370_s22 + $0x20] sm:$0xff] %vm580_vm1, %v576_v48 }
 0x234   : > { %v559_v39 = vpop.xlane.xlu1 %558  ;;  %v568_v53 = vpop.xlane.xlu0 %567 }
 0x235   : > { %v575_v40 = vadd.f32 %v559_v39, %v527_v37  ;;  %v578_v54 = vadd.f32 %v568_v53, %v530_v50 }
 0x237   : > { %584 = vst.msk [vmem:[%s1370_s22 + $0x18] sm:$0xff] %vm580_vm1, %v575_v40  ;;  %587 = vst.msk [vmem:[%s1370_s22 + $0x30] sm:$0xff] %vm580_vm1, %v578_v54 }
 0x238   : > { %v565_v45 = vpop.xlane.xlu1 %564 }
 0x239   : > { %v577_v46 = vadd.f32 %v565_v45, %v529_v43 }
 0x23b   : > { %586 = vst.msk [vmem:[%s1370_s22 + $0x28] sm:$0xff] %vm580_vm1, %v577_v46 }
 0x23c   : > { %v571_v51 = vpop.xlane.xlu1 %570 }
 0x23d   : > { %v579_v52 = vadd.f32 %v571_v51, %v531_v49 }
 0x23f   : > { %588 = vst.msk [vmem:[%s1370_s22 + $0x38] sm:$0xff] %vm580_vm1, %v579_v52 }
 0x240 PF: > { %s18_s21 = sadd.s32 1, %s1084_s21   ;;  %s1522_s27 = sld [smem:[#allocation12_spill]] }
 0x241   : > { %p1430_p7 = scmp.ge.s32.totalorder %s18_s21, 10   ;;  %s1523_s4 = sld [smem:[#allocation14_spill]] }
 0x242   : > { %s1525_s9 = smov %s1040_s10  ;;  %s1526_s10 = smov %s1044_s11 }
 0x243   : > { %s1527_s11 = smov %s1293_s28  ;;  %s1528_s12 = smov %s1052_s13 }
 0x244   : > { %s1529_s13 = smov %s1056_s14  ;;  %s1530_s14 = smov %s1303_s15 }
 0x245   : > { %s1531_s15 = smov %s1072_s18  ;;  %s1532_s16 = smov %s1076_s19 }
 0x246   : > { %s1533_s17 = smov %s1080_s20  ;;  %s1534_s18 = smov %s1522_s27 }
 0x247   : > { %s1535_s19 = smov %s1523_s4  ;;  %s1536_s20 = smov %s1546_s24 }
 0x248   :  { %17 = sbr.rel (!%p1430_p7) target bundleno = 13 (0xd), region = 93 }
 0x24f   :  { %611 = vsyncpa [#allocation4], 1 }
 0x250   :  { %613 = vsyncpa [#allocation4 + $0x1], 1 }
 0x251   :  { %614 = vsyncpa [#allocation6], 1 }
 0x252   :  { %616 = vsyncpa [#allocation6 + $0x1], 1 }

</bundles_post_ra>
